<compile_context>
chip_gen: v7x
topology: tpu7x:2x2x1
jax: 0.10.0
libtpu: 0.0.40
codegen_flags: <defaults>
</compile_context>

<pallas_src>
import math

import jax
import jax.numpy as jnp
from jax.experimental import pallas as pl
from jax.experimental.pallas import tpu as pltpu

# Well above v5e's 16 MiB scoped default, below v7x's 64 MiB physical VMEM.
_VMEM_LIMIT = 48 * 1024 * 1024


def _round_up(n, m):
    return ((n + m - 1) // m) * m


def _choose_tile_and_pad(n, max_tile=512):
    """Pick the tile first, then pad n to a multiple of it (bounded waste)."""
    n_aligned = _round_up(max(int(n), 1), 128)
    tile = min(max_tile, n_aligned)
    return tile, _round_up(n_aligned, tile)


# --------------------------------------------------------------------------- #
# Kernel 1: tiled scaled-RBF kernel matrix  k(A,B) = s * exp(-0.5*||a-b||^2)
# (inputs pre-scaled by 1/lengthscale; row norms precomputed; B fed transposed
#  so the MXU sees a standard (tp,D)@(D,tq) matmul; outputscale lives in SMEM)
# --------------------------------------------------------------------------- #
def _rbf_tile_body(os_ref, a_ref, bt_ref, a2_ref, b2_ref, o_ref):
    ab = jnp.dot(a_ref[...], bt_ref[...], preferred_element_type=jnp.float32)
    sq = jnp.maximum(a2_ref[...] + b2_ref[...] - 2.0 * ab, 0.0)
    o_ref[...] = os_ref[0] * jnp.exp(-0.5 * sq)


def rbf_kernel(a_scaled, bt_scaled, a2_col, b2_row, outputscale_s,
               tile_p, tile_q):
    P, D = a_scaled.shape
    Q = bt_scaled.shape[1]
    return pl.pallas_call(
        _rbf_tile_body,
        out_shape=jax.ShapeDtypeStruct((P, Q), jnp.float32),
        grid=(P // tile_p, Q // tile_q),
        in_specs=[
            pl.BlockSpec(memory_space=pltpu.MemorySpace.SMEM),   # outputscale
            pl.BlockSpec((tile_p, D), lambda i, j: (i, 0)),      # A_i (scaled)
            pl.BlockSpec((D, tile_q), lambda i, j: (0, j)),      # B_j^T (scaled)
            pl.BlockSpec((tile_p, 1), lambda i, j: (i, 0)),      # ||a_i||^2
            pl.BlockSpec((1, tile_q), lambda i, j: (0, j)),      # ||b_j||^2
        ],
        out_specs=pl.BlockSpec((tile_p, tile_q), lambda i, j: (i, j)),
        compiler_params=pltpu.CompilerParams(
            dimension_semantics=("parallel", "parallel"),
            vmem_limit_bytes=_VMEM_LIMIT),
    )(outputscale_s, a_scaled, bt_scaled, a2_col, b2_row)


# --------------------------------------------------------------------------- #
# Kernel 2: fused SVGP predictive covariance, tiled over (i, j) output tiles
# with an M-reduction axis k (last, "arbitrary").  The f32 output tile is the
# accumulator:
#   k==0 : covar[i,j]  = k(X_i,X_j) (+ jitter*I if i==j)        (fused RBF tile)
#   all k: covar[i,j] += interp_i^T[.,k] @ C[k,.]_j              (bf16 MXU strips)
# --------------------------------------------------------------------------- #
def _covar_tile_body(os_ref, jit_ref, xi_ref, xjt_ref, x2i_ref, x2j_ref,
                     ui_ref, cj_ref, covar_ref):
    i = pl.program_id(0)
    j = pl.program_id(1)
    k = pl.program_id(2)

    @pl.when(k == 0)
    def _():
        # fused K_xx tile (RBF between X row-tiles i and j), f32 for accuracy
        ab = jnp.dot(xi_ref[...], xjt_ref[...],
                     preferred_element_type=jnp.float32)          # [tn, tn]
        sq = jnp.maximum(x2i_ref[...] + x2j_ref[...] - 2.0 * ab, 0.0)
        base = os_ref[0] * jnp.exp(-0.5 * sq)
        tn = base.shape[0]
        r = jax.lax.broadcasted_iota(jnp.int32, (tn, tn), 0)
        c = jax.lax.broadcasted_iota(jnp.int32, (tn, tn), 1)
        diag_add = jnp.where(i == j, jit_ref[0], jnp.float32(0.0))
        covar_ref[...] = base + jnp.where(r == c, diag_add, jnp.float32(0.0))

    # collapsed quad form chunk: interp_i^T @ C_j over the k-th M block
    covar_ref[...] += jnp.dot(ui_ref[...], cj_ref[...],
                              preferred_element_type=jnp.float32)


def gp_covar_fused(x_scaled, xt_scaled, x2_col, x2_row, interp_t, c_mat,
                   outputscale_s, jitter_s, tile_n, tile_m):
    Np, D = x_scaled.shape
    Mp = c_mat.shape[0]
    return pl.pallas_call(
        _covar_tile_body,
        out_shape=jax.ShapeDtypeStruct((Np, Np), jnp.float32),
        grid=(Np // tile_n, Np // tile_n, Mp // tile_m),
        in_specs=[
            pl.BlockSpec(memory_space=pltpu.MemorySpace.SMEM),       # outputscale
            pl.BlockSpec(memory_space=pltpu.MemorySpace.SMEM),       # jitter
            pl.BlockSpec((tile_n, D), lambda i, j, k: (i, 0)),       # X_i (scaled)
            pl.BlockSpec((D, tile_n), lambda i, j, k: (0, j)),       # X_j^T
            pl.BlockSpec((tile_n, 1), lambda i, j, k: (i, 0)),       # ||x_i||^2
            pl.BlockSpec((1, tile_n), lambda i, j, k: (0, j)),       # ||x_j||^2
            pl.BlockSpec((tile_n, tile_m), lambda i, j, k: (i, k)),  # interp^T_i
            pl.BlockSpec((tile_m, tile_n), lambda i, j, k: (k, j)),  # C_j
        ],
        out_specs=pl.BlockSpec((tile_n, tile_n), lambda i, j, k: (i, j)),
        compiler_params=pltpu.CompilerParams(
            dimension_semantics=("parallel", "parallel", "arbitrary"),
            vmem_limit_bytes=_VMEM_LIMIT),
    )(outputscale_s, jitter_s, x_scaled, xt_scaled, x2_col, x2_row,
      interp_t, c_mat)
    # TODO(synk): for very large M (compute-bound regime), exploit covar symmetry
    # by iterating only i<=j tiles via PrefetchScalarGridSpec and mirroring.


# --------------------------------------------------------------------------- #
# DGKL forward (feature_extractor=None -> features = inputs)
# --------------------------------------------------------------------------- #
def dgkl_forward(x, inducing_points, var_mean, chol_var, mean_constant,
                 lengthscale, outputscale, jitter=1e-4):
    x = jnp.asarray(x, jnp.float32)
    z = jnp.asarray(inducing_points, jnp.float32)
    N, D = x.shape
    M = z.shape[0]

    # pick tiles first, pad row counts to a tile multiple (lane/MXU friendly)
    tn, Np = _choose_tile_and_pad(N)
    tm, Mp = _choose_tile_and_pad(M)

    inv_ls = jnp.float32(1.0) / jnp.asarray(lengthscale, jnp.float32)
    os_s = jnp.asarray(outputscale, jnp.float32).reshape((1,))
    jit_s = jnp.asarray(jitter, jnp.float32).reshape((1,))

    x_pad = jnp.zeros((Np, D), jnp.float32).at[:N].set(x)
    z_pad = jnp.zeros((Mp, D), jnp.float32).at[:M].set(z)
    xs = x_pad * inv_ls
    zs = z_pad * inv_ls
    xs_t = jnp.transpose(xs)
    x2 = jnp.sum(xs * xs, axis=1, keepdims=True)              # [Np, 1]
    z2 = jnp.sum(zs * zs, axis=1, keepdims=True)              # [Mp, 1]

    # inducing kernel matrices via the tiled Pallas RBF kernel (f32: K_zz feeds
    # the Cholesky, so precision matters here)
    k_zz = rbf_kernel(zs, jnp.transpose(zs), z2, jnp.transpose(z2), os_s,
                      tm, tm)[:M, :M]
    k_zx = rbf_kernel(zs, xs_t, z2, jnp.transpose(x2), os_s, tm, tn)[:M, :]

    # TODO(synk): Cholesky factorization and the triangular solve are inherently
    # sequential; no clean Pallas TPU equivalent, so they stay in plain JAX.
    k_zz = k_zz + jnp.asarray(jitter, jnp.float32) * jnp.eye(M, dtype=jnp.float32)
    chol_kzz = jnp.linalg.cholesky(k_zz)
    interp = jax.scipy.linalg.solve_triangular(chol_kzz, k_zx, lower=True)  # [M,Np]

    # predictive mean (tiny matvec; done outside the covar kernel so both of its
    # grid axes can be "parallel")
    mean = (jnp.dot(jnp.asarray(var_mean, jnp.float32), interp)[:N]
            + jnp.asarray(mean_constant, jnp.float32))

    # collapse the quad form: C = (Lv Lv^T - I) @ interp  (cheap O(M^2 N) in XLA)
    lv = jnp.tril(jnp.asarray(chol_var, jnp.float32))
    mid = jnp.dot(lv, lv.T) - jnp.eye(M, dtype=jnp.float32)
    c_small = jnp.dot(mid, interp)                             # [M, Np]

    # zero-pad the M axis (exact: padded rows contribute nothing) and cast the
    # big MXU strips to bf16 (halves strip DMA + VMEM; f32 accumulation kept)
    interp_t = jnp.zeros((Np, Mp), jnp.bfloat16).at[:, :M].set(
        jnp.transpose(interp).astype(jnp.bfloat16))
    c_p = jnp.zeros((Mp, Np), jnp.bfloat16).at[:M].set(
        c_small.astype(jnp.bfloat16))

    covar_p = gp_covar_fused(xs, xs_t, x2, jnp.transpose(x2), interp_t, c_p,
                             os_s, jit_s, tn, tm)
    return mean, covar_p[:N, :N]


# --------------------------------------------------------------------------- #
# plain-JAX reference for validation
# --------------------------------------------------------------------------- #
def _ref_forward(x, z, var_mean, chol_var, c, lengthscale, outputscale,
                 jitter=1e-4):
    def k(a, b):
        a = a / lengthscale
        b = b / lengthscale
        sq = (jnp.sum(a * a, 1)[:, None] + jnp.sum(b * b, 1)[None, :]
              - 2.0 * a @ b.T)
        return outputscale * jnp.exp(-0.5 * jnp.maximum(sq, 0.0))

    M = z.shape[0]
    kzz = k(z, z) + jitter * jnp.eye(M, dtype=jnp.float32)
    L = jnp.linalg.cholesky(kzz)
    interp = jax.scipy.linalg.solve_triangular(L, k(z, x), lower=True)
    lv = jnp.tril(chol_var)
    mid = lv @ lv.T - jnp.eye(M, dtype=jnp.float32)
    mean = interp.T @ var_mean + c
    covar = (k(x, x) + jitter * jnp.eye(x.shape[0], dtype=jnp.float32)
             + interp.T @ mid @ interp)
    return mean, covar


if __name__ == "__main__":
    key = jax.random.PRNGKey(0)
    k1, k2, k3, k4 = jax.random.split(key, 4)

    # small shapes: N test points, D features, M inducing points
    N, D, M = 300, 32, 96

    inducing_points = jax.random.normal(k1, (M, D), dtype=jnp.float32)
    x = jax.random.normal(k2, (N, D), dtype=jnp.float32)

    # construct_kernel(): lengthscale = mean pairwise distance of inducing points
    diffs = inducing_points[:, None, :] - inducing_points[None, :, :]
    dists = jnp.sqrt(jnp.sum(diffs * diffs, axis=-1))
    iu = jnp.triu_indices(M, k=1)
    lengthscale = float(jnp.mean(dists[iu]))
    # ScaleKernel: outputscale = softplus(raw_outputscale=0) = log(2)
    outputscale = math.log(2.0)

    # CholeskyVariationalDistribution params (deterministic synthetic init)
    var_mean = 0.01 * jax.random.normal(k3, (M,), dtype=jnp.float32)
    chol_var = (jnp.eye(M, dtype=jnp.float32)
                + 0.01 * jnp.tril(jax.random.normal(k4, (M, M),
                                                    dtype=jnp.float32), k=-1))
    mean_constant = 0.0   # ConstantMean

    mean, covar = dgkl_forward(x, inducing_points, var_mean, chol_var,
                               mean_constant, lengthscale, outputscale)
    jax.block_until_ready((mean, covar))

    assert mean.shape == (N,) and covar.shape == (N, N)
    assert bool(jnp.all(jnp.isfinite(mean))) and bool(jnp.all(jnp.isfinite(covar)))

    ref_mean, ref_covar = _ref_forward(x, inducing_points, var_mean, chol_var,
                                       mean_constant, lengthscale, outputscale)
    assert bool(jnp.allclose(mean, ref_mean, rtol=1e-2, atol=1e-3))
    # slightly looser atol: the (small-magnitude) quad-form correction strips are
    # intentionally fed to the MXU in bf16
    assert bool(jnp.allclose(covar, ref_covar, rtol=1e-2, atol=2e-3))

    print("KERNEL_OK")
</pallas_src>

<mosaic_0001>
module attributes {stable_mosaic.version = 11 : i64} {
  func.func @_rbf_tile_body(%arg0: i32, %arg1: i32, %arg2: memref<1xf32, #tpu.memory_space<smem>>, %arg3: memref<128x32xf32, #tpu.memory_space<vmem>>, %arg4: memref<32x128xf32, #tpu.memory_space<vmem>>, %arg5: memref<128x1xf32, #tpu.memory_space<vmem>>, %arg6: memref<1x128xf32, #tpu.memory_space<vmem>>, %arg7: memref<128x128xf32, #tpu.memory_space<vmem>>) attributes {dimension_semantics = [#tpu.dimension_semantics<parallel>, #tpu.dimension_semantics<parallel>], iteration_bounds = array<i64: 1, 1>, scalar_prefetch = 0 : i64, scratch_operands = 0 : i64, tpu.core_type = #tpu.core_type<tc>, window_params = [{transform_indices = @transform_0, window_bounds = array<i64: 1>}, {transform_indices = @transform_1, window_bounds = array<i64: 128, 32>}, {transform_indices = @transform_2, window_bounds = array<i64: 32, 128>}, {transform_indices = @transform_3, window_bounds = array<i64: 128, 1>}, {transform_indices = @transform_4, window_bounds = array<i64: 1, 128>}, {transform_indices = @transform_5, window_bounds = array<i64: 128, 128>}]} {
    %c0 = arith.constant 0 : index
    %c0_0 = arith.constant 0 : index
    %0 = vector.load %arg3[%c0, %c0_0] : memref<128x32xf32, #tpu.memory_space<vmem>>, vector<128x32xf32>
    %c0_1 = arith.constant 0 : index
    %c0_2 = arith.constant 0 : index
    %1 = vector.load %arg4[%c0_1, %c0_2] : memref<32x128xf32, #tpu.memory_space<vmem>>, vector<32x128xf32>
    %cst = arith.constant dense<0.000000e+00> : vector<128x128xf32>
    %2 = tpu.matmul %0, %1, %cst {dimension_numbers = #tpu.dot_dimension_numbers<[1], [0], [0], [1], [0, 0, 1, 1], [], []>} : vector<128x32xf32>, vector<32x128xf32>, vector<128x128xf32> -> vector<128x128xf32>
    %c0_3 = arith.constant 0 : index
    %c0_4 = arith.constant 0 : index
    %3 = vector.load %arg5[%c0_3, %c0_4] : memref<128x1xf32, #tpu.memory_space<vmem>>, vector<128x1xf32>
    %c0_5 = arith.constant 0 : index
    %c0_6 = arith.constant 0 : index
    %4 = vector.load %arg6[%c0_5, %c0_6] : memref<1x128xf32, #tpu.memory_space<vmem>>, vector<1x128xf32>
    %5 = vector.broadcast %3 : vector<128x1xf32> to vector<128x128xf32>
    %6 = vector.broadcast %4 : vector<1x128xf32> to vector<128x128xf32>
    %7 = arith.addf %5, %6 : vector<128x128xf32>
    %cst_7 = arith.constant 2.000000e+00 : f32
    %8 = vector.broadcast %cst_7 : f32 to vector<128x128xf32>
    %9 = arith.mulf %8, %2 : vector<128x128xf32>
    %10 = arith.subf %7, %9 : vector<128x128xf32>
    %cst_8 = arith.constant 0.000000e+00 : f32
    %11 = vector.broadcast %cst_8 : f32 to vector<128x128xf32>
    %12 = arith.maximumf %10, %11 : vector<128x128xf32>
    %c0_9 = arith.constant 0 : index
    %13 = memref.load %arg2[%c0_9] : memref<1xf32, #tpu.memory_space<smem>>
    %cst_10 = arith.constant -5.000000e-01 : f32
    %14 = vector.broadcast %cst_10 : f32 to vector<128x128xf32>
    %15 = arith.mulf %14, %12 : vector<128x128xf32>
    %16 = math.exp %15 : vector<128x128xf32>
    %17 = vector.broadcast %13 : f32 to vector<128x128xf32>
    %18 = arith.mulf %17, %16 : vector<128x128xf32>
    %c0_11 = arith.constant 0 : index
    %c0_12 = arith.constant 0 : index
    %19 = vector.load %arg7[%c0_11, %c0_12] : memref<128x128xf32, #tpu.memory_space<vmem>>, vector<128x128xf32>
    tpu.vector_store %arg7[%c0_11, %c0_12], %18 {strides = array<i32>} : memref<128x128xf32, #tpu.memory_space<vmem>>, vector<128x128xf32>,
    return
  }
  func.func @transform_0(%arg0: i32, %arg1: i32) -> i32 {
    %c0_i32 = arith.constant 0 : i32
    %c0_i32_0 = arith.constant 0 : i32
    return %c0_i32 : i32
  }
  func.func @transform_1(%arg0: i32, %arg1: i32) -> (i32, i32) {
    %c0_i32 = arith.constant 0 : i32
    %c0_i32_0 = arith.constant 0 : i32
    return %arg0, %c0_i32 : i32, i32
  }
  func.func @transform_2(%arg0: i32, %arg1: i32) -> (i32, i32) {
    %c0_i32 = arith.constant 0 : i32
    %c0_i32_0 = arith.constant 0 : i32
    return %c0_i32, %arg1 : i32, i32
  }
  func.func @transform_3(%arg0: i32, %arg1: i32) -> (i32, i32) {
    %c0_i32 = arith.constant 0 : i32
    %c0_i32_0 = arith.constant 0 : i32
    return %arg0, %c0_i32 : i32, i32
  }
  func.func @transform_4(%arg0: i32, %arg1: i32) -> (i32, i32) {
    %c0_i32 = arith.constant 0 : i32
    %c0_i32_0 = arith.constant 0 : i32
    return %c0_i32, %arg1 : i32, i32
  }
  func.func @transform_5(%arg0: i32, %arg1: i32) -> (i32, i32) {
    %c0_i32 = arith.constant 0 : i32
    return %arg0, %arg1 : i32, i32
  }
}

</mosaic_0001>

<bundles_post_ra>
// kernel: tpu_custom_call.1
= control target key start
LH: loop header
LB: loop body
LE: loop exit
PB: predicated region body
PF: predicated region fallthrough
CT: control target
= control target key end

     0   :  { %vm42_vm0 = vcmask 261120   ;;  %v644_v7 = vmov 0   ;;  %s862_s0 = inlined_call_operand.<no memory space> [shape: f32[1], index: 0, kind: input, shape index: {}]   ;;  %s863_s1 = inlined_call_operand.vmem [shape: f32[128,32], index: 1, kind: input, shape index: {}]   ;;  %s864_s2 = inlined_call_operand.vmem [shape: f32[32,128], index: 2, kind: input, shape index: {}]   ;;  %s865_s3 = inlined_call_operand.vmem [shape: f32[128,1], index: 3, kind: input, shape index: {}]   ;;  %s866_s4 = inlined_call_operand.vmem [shape: f32[1,128], index: 4, kind: input, shape index: {}]   ;;  %s867_s5 = inlined_call_operand.hbm [shape: f32[128,128], index: 5, kind: output, shape index: {}]  }
   0x1   :  { %v38_v0 = vld [vmem:[%s864_s2] sm:$0xff]  ;;  %v39_v1 = vld [vmem:[%s864_s2 + $0x8] sm:$0xff]  ;;  %v40_v2 = vld [vmem:[%s864_s2 + $0x10] sm:$0xff]  ;;  %587 = vset.pattern.permute.xlu1 %v644_v7  ;;  %586 = vset.pattern.permute.xlu0 %v644_v7 }
   0x2   :  { %v570_v3 = vpack.c.bf16 %v39_v1, %v38_v0  ;;  %v41_v4 = vld [vmem:[%s864_s2 + $0x18] sm:$0xff]  ;;  %v22_v5 = vld [vmem:[%s863_s1] sm:$0xff]  ;;  %v238_v9 = vld [vmem:[%s865_s3 + $0x10] sm:$0xff] }
   0x3   :  { %v30_v6 = vld [vmem:[%s863_s1 + $0x40] sm:$0xff]  ;;  %v574_v8 = vpack.c.bf16 %v41_v4, %v40_v2  ;;  %546 = vmatprep.mubr.msk.f32.mxu0 %vm42_vm0, %v22_v5  ;;  %265 = vperm.xlu1 %587, %v238_v9   ;;  %v23_v11 = vld [vmem:[%s863_s1 + $0x8] sm:$0xff]  ;;  %v24_v13 = vld [vmem:[%s863_s1 + $0x10] sm:$0xff] }
   0x4   :  { %558 = vmatprep.mubr.msk.f32.mxu1 %vm42_vm0, %v30_v6  ;;  %571 = vmatprep.subr.bf16.mxu0 %v570_v3  ;;  %v236_v10 = vld [vmem:[%s865_s3] sm:$0xff]  ;;  %v31_v12 = vld [vmem:[%s863_s1 + $0x48] sm:$0xff]  ;;  %v32_v14 = vld [vmem:[%s863_s1 + $0x50] sm:$0xff] }
   0x5   :  { %578 = vmatprep.subr.bf16.mxu1 %v570_v3  ;;  %573 = vmatpush3.bf16.msra.mxu0 %v570_v3  ;;  %v239_v15 = vld [vmem:[%s865_s3 + $0x18] sm:$0xff]  ;;  %v237_v16 = vld [vmem:[%s865_s3 + $0x8] sm:$0xff] }
   0x6   :  { %580 = vmatpush3.bf16.msra.mxu1 %v570_v3  ;;  %575 = vmatprep.subr.bf16.mxu0 %v574_v8  ;;  %v25_v17 = vld [vmem:[%s863_s1 + $0x18] sm:$0xff] }
   0x7   :  { %579 = vmatprep.subr.bf16.mxu1 %v574_v8  ;;  %255 = vperm.xlu0 %586, %v236_v10   ;;  %v33_v18 = vld [vmem:[%s863_s1 + $0x58] sm:$0xff] }
   0x9   :  { %577 = vmatpush3.bf16.msra.mxu0 %v574_v8 }
   0xa   :  { %581 = vmatpush3.bf16.msra.mxu1 %v574_v8 }
   0xc   :  { %547 = vmatmul.mubr.msk.f32.vlgmr.msra.gmra.mrb[0].mxu0 %vm42_vm0, %v23_v11 }
   0xd   :  { %559 = vmatmul.mubr.msk.f32.vlgmr.msra.gmra.mrb[0].mxu1 %vm42_vm0, %v31_v12  ;;  %549 = vmatprep.mubr.msk.f32.mxu0 %vm42_vm0, %v24_v13 }
   0xe   :  { %561 = vmatprep.mubr.msk.f32.mxu1 %vm42_vm0, %v32_v14 }
   0xf   :  { %11 = vsyncpa [#allocation4], 0  ;;  %v26_v19 = vld [vmem:[%s863_s1 + $0x20] sm:$0xff]  ;;  %270 = vperm.xlu1 %587, %v239_v15   ;;  %260 = vperm.xlu0 %586, %v237_v16   ;;  %v241_v21 = vld [vmem:[%s865_s3 + $0x28] sm:$0xff]  ;;  %v808_v54 = vstv %s862_s0  ;;  %s645_s0 = smov [#allocation3]  }
  0x10   :  { %v34_v20 = vld [vmem:[%s863_s1 + $0x60] sm:$0xff]  ;;  %550 = vmatmul.mubr.msk.f32.gmra.mrb[2].mxu0 %vm42_vm0, %v25_v17  ;;  %v27_v23 = vld [vmem:[%s863_s1 + $0x28] sm:$0xff]  ;;  %v28_v25 = vld [vmem:[%s863_s1 + $0x30] sm:$0xff] }
  0x11   :  { %v240_v22 = vld [vmem:[%s865_s3 + $0x20] sm:$0xff]  ;;  %562 = vmatmul.mubr.msk.f32.gmra.mrb[2].mxu1 %vm42_vm0, %v33_v18  ;;  %552 = vmatprep.mubr.msk.f32.mxu0 %vm42_vm0, %v26_v19  ;;  %v35_v24 = vld [vmem:[%s863_s1 + $0x68] sm:$0xff]  ;;  %v36_v26 = vld [vmem:[%s863_s1 + $0x70] sm:$0xff] }
  0x12   :  { %564 = vmatprep.mubr.msk.f32.mxu1 %vm42_vm0, %v34_v20  ;;  %v243_v27 = vld [vmem:[%s865_s3 + $0x38] sm:$0xff]  ;;  %v242_v28 = vld [vmem:[%s865_s3 + $0x30] sm:$0xff]  ;;  %v245_v31 = vld [vmem:[%s865_s3 + $0x48] sm:$0xff] }
  0x13   :  { %280 = vperm.xlu1 %587, %v241_v21   ;;  %275 = vperm.xlu0 %586, %v240_v22   ;;  %v29_v29 = vld [vmem:[%s863_s1 + $0x38] sm:$0xff]  ;;  %v244_v32 = vld [vmem:[%s865_s3 + $0x40] sm:$0xff]  ;;  %v246_v34 = vld [vmem:[%s865_s3 + $0x50] sm:$0xff] }
  0x14   :  { %553 = vmatmul.mubr.msk.f32.gmra.mrb[4].mxu0 %vm42_vm0, %v27_v23  ;;  %v37_v30 = vld [vmem:[%s863_s1 + $0x78] sm:$0xff]  ;;  %v249_v35 = vld [vmem:[%s865_s3 + $0x68] sm:$0xff]  ;;  %v248_v36 = vld [vmem:[%s865_s3 + $0x60] sm:$0xff] }
  0x15   :  { %565 = vmatmul.mubr.msk.f32.gmra.mrb[4].mxu1 %vm42_vm0, %v35_v24  ;;  %555 = vmatprep.mubr.msk.f32.mxu0 %vm42_vm0, %v28_v25  ;;  %v247_v33 = vld [vmem:[%s865_s3 + $0x58] sm:$0xff]  ;;  %v250_v38 = vld [vmem:[%s865_s3 + $0x70] sm:$0xff]  ;;  %v517_v53 = vld [vmem:[%s866_s4] ss:$0 sm:$0xff]  ;;  %s490_s4 = sshll.u32 %s645_s0, 4  ;;  %s491_s4 = int_to_ptr.vmem [resolvable:$true] %s490_s4 }
  0x16   :  { %567 = vmatprep.mubr.msk.f32.mxu1 %vm42_vm0, %v36_v26  ;;  %v251_v37 = vld [vmem:[%s865_s3 + $0x78] sm:$0xff]  ;;  %s620_s14 = scalar_lea.vmem %s491_s4, 2048  ;;  %p625_p1 = scmp.lt.s32.totalorder %s491_s4, %s491_s4 }
  0x17   :  { %290 = vperm.xlu1 %587, %v243_v27   ;;  %285 = vperm.xlu0 %586, %v242_v28   ;;  %p621_p0 = scmp.ne.s32.totalorder %s491_s4, %s620_s14  ;;  %p626_p2 = scmp.lt.s32.totalorder %s620_s14, %s620_s14 }
  0x18   :  { %556 = vmatmul.mubr.msk.f32.gmra.mrb[6].mxu0 %vm42_vm0, %v29_v29 }
  0x19   :  { %568 = vmatmul.mubr.msk.f32.gmra.mrb[6].mxu1 %vm42_vm0, %v37_v30  ;;  %p627_p3 = por %p626_p2, %p625_p1 }
  0x1b   :  { %300 = vperm.xlu1 %587, %v245_v31   ;;  %295 = vperm.xlu0 %586, %v244_v32   ;;  %p628_p4 = pnand %p627_p3, %p621_p0 }
  0x1f   :  { %310 = vperm.xlu1 %587, %v247_v33   ;;  %305 = vperm.xlu0 %586, %v246_v34  }
  0x23   :  { %320 = vperm.xlu1 %587, %v249_v35   ;;  %315 = vperm.xlu0 %586, %v248_v36  }
  0x27   :  { %330 = vperm.xlu1 %587, %v251_v37   ;;  %325 = vperm.xlu0 %586, %v250_v38  }
  0x82   :  { %v266_v39 = vpop.permute.xlu1 %265 }
  0x83   :  { %v341_v55 = vadd.f32 %v517_v53, %v266_v39 }
  0x86   :  { %v256_v40 = vpop.permute.xlu0 %255 }
  0x87   :  { %v339_v56 = vadd.f32 %v517_v53, %v256_v40 }
  0x8e   :  { %v271_v41 = vpop.permute.xlu1 %270  ;;  %v261_v42 = vpop.permute.xlu0 %260 }
  0x8f   :  { %v342_v57 = vadd.f32 %v517_v53, %v271_v41  ;;  %v340_v58 = vadd.f32 %v517_v53, %v261_v42 }
  0x92   :  { %v281_v43 = vpop.permute.xlu1 %280  ;;  %v276_v44 = vpop.permute.xlu0 %275 }
  0x93   :  { %v810_v61 = vadd.f32 %v517_v53, %v281_v43  ;;  %v812_v62 = vadd.f32 %v517_v53, %v276_v44 }
  0x96   :  { %v291_v45 = vpop.permute.xlu1 %290  ;;  %v286_v46 = vpop.permute.xlu0 %285 }
  0x97   :  { %v814_v63 = vadd.f32 %v517_v53, %v291_v45  ;;  %v816_v0 = vadd.f32 %v517_v53, %v286_v46 }
  0x9a   :  { %v301_v47 = vpop.permute.xlu1 %300  ;;  %v296_v48 = vpop.permute.xlu0 %295 }
  0x9b   :  { %v348_v3 = vadd.f32 %v517_v53, %v301_v47  ;;  %v347_v4 = vadd.f32 %v517_v53, %v296_v48 }
  0x9e   :  { %v311_v49 = vpop.permute.xlu1 %310  ;;  %v306_v50 = vpop.permute.xlu0 %305 }
  0x9f   :  { %v350_v9 = vadd.f32 %v517_v53, %v311_v49  ;;  %v349_v10 = vadd.f32 %v517_v53, %v306_v50 }
  0xa2   :  { %v321_v51 = vpop.permute.xlu1 %320  ;;  %v316_v52 = vpop.permute.xlu0 %315 }
  0xa3   :  { %v818_v13 = vadd.f32 %v517_v53, %v321_v51  ;;  %v820_v14 = vadd.f32 %v517_v53, %v316_v52 }
  0xa6   :  { %v331_v59 = vpop.permute.xlu1 %330  ;;  %v326_v60 = vpop.permute.xlu0 %325 }
  0xa7   :  { %v822_v17 = vadd.f32 %v517_v53, %v331_v59  ;;  %v824_v18 = vadd.f32 %v517_v53, %v326_v60 }
  0xdf   :  { %v548_v1 = vpop.f32.mrb[0].mxu0 }
  0xe0   :  { %v560_v2 = vpop.f32.mrb[0].mxu1  ;;  %v356_v5 = vmul.f32 2.0, %v548_v1  ;;  %v157_v7 = vpop.f32.mrb[1].mxu0 }
  0xe1   :  { %v364_v6 = vmul.f32 2.0, %v560_v2  ;;  %v197_v8 = vpop.f32.mrb[1].mxu1  ;;  %v355_v11 = vmul.f32 2.0, %v157_v7 }
  0xe2   :  { %v363_v12 = vmul.f32 2.0, %v197_v8  ;;  %v372_v15 = vsub.f32 %v340_v58, %v356_v5 }
  0xe3   :  { %v380_v16 = vsub.f32 %v348_v3, %v364_v6  ;;  %v371_v19 = vsub.f32 %v339_v56, %v355_v11  ;;  %v551_v21 = vpop.f32.mrb[2].mxu0 }
  0xe4   :  { %v379_v20 = vsub.f32 %v347_v4, %v363_v12  ;;  %v563_v22 = vpop.f32.mrb[2].mxu1  ;;  %v388_v23 = vmax.f32 %v372_v15, 0.0  ;;  %v358_v25 = vmul.f32 2.0, %v551_v21  ;;  %v167_v27 = vpop.f32.mrb[3].mxu0 }
  0xe5   :  { %v396_v24 = vmax.f32 %v380_v16, 0.0  ;;  %v366_v26 = vmul.f32 2.0, %v563_v22  ;;  %v207_v28 = vpop.f32.mrb[3].mxu1  ;;  %v387_v29 = vmax.f32 %v371_v19, 0.0  ;;  %v357_v31 = vmul.f32 2.0, %v167_v27 }
  0xe6   :  { %v395_v30 = vmax.f32 %v379_v20, 0.0  ;;  %v365_v32 = vmul.f32 2.0, %v207_v28  ;;  %v405_v33 = vmul.f32 -0.5, %v388_v23  ;;  %v374_v35 = vsub.f32 %v342_v57, %v358_v25 }
  0xe7   :  { %v413_v34 = vmul.f32 -0.5, %v396_v24  ;;  %v382_v36 = vsub.f32 %v350_v9, %v366_v26  ;;  %v404_v37 = vmul.f32 -0.5, %v387_v29  ;;  %v373_v39 = vsub.f32 %v341_v55, %v357_v31  ;;  %v554_v41 = vpop.f32.mrb[4].mxu0 }
  0xe8   :  { %v412_v38 = vmul.f32 -0.5, %v395_v30  ;;  %v381_v40 = vsub.f32 %v349_v10, %v365_v32  ;;  %v566_v42 = vpop.f32.mrb[4].mxu1  ;;  %v422_v43 = vmul.f32 1.442695, %v405_v33  ;;  %v390_v45 = vmax.f32 %v374_v35, 0.0  ;;  %v177_v56 = vpop.f32.mrb[5].mxu0 }
  0xe9   :  { %v438_v44 = vmul.f32 1.442695, %v413_v34  ;;  %v398_v46 = vmax.f32 %v382_v36, 0.0  ;;  %v420_v47 = vmul.f32 1.442695, %v404_v37  ;;  %v389_v49 = vmax.f32 %v373_v39, 0.0 }
  0xea   :  { %v436_v48 = vmul.f32 1.442695, %v412_v38  ;;  %v397_v50 = vmax.f32 %v381_v40, 0.0  ;;  %588 = vpow2.f32 %v422_v43  ;;  %v407_v51 = vmul.f32 -0.5, %v390_v45  ;;  %v217_v57 = vpop.f32.mrb[5].mxu1 }
  0xeb   :  { %v415_v52 = vmul.f32 -0.5, %v398_v46  ;;  %v360_v53 = vmul.f32 2.0, %v554_v41  ;;  %590 = vpow2.f32 %v438_v44  ;;  %v406_v58 = vmul.f32 -0.5, %v389_v49  ;;  %v557_v60 = vpop.f32.mrb[6].mxu0 }
  0xec   :  { %v414_v55 = vmul.f32 -0.5, %v397_v50  ;;  %v368_v59 = vmul.f32 2.0, %v566_v42  ;;  %v569_v1 = vpop.f32.mrb[6].mxu1  ;;  %592 = vpow2.f32 %v420_v47  ;;  %v426_v2 = vmul.f32 1.442695, %v407_v51  ;;  %v187_v5 = vpop.f32.mrb[7].mxu0 }
  0xed   :  { %v442_v3 = vmul.f32 1.442695, %v415_v52  ;;  %v376_v4 = vsub.f32 %v810_v61, %v360_v53  ;;  %v227_v6 = vpop.f32.mrb[7].mxu1  ;;  %594 = vpow2.f32 %v436_v48  ;;  %v424_v7 = vmul.f32 1.442695, %v406_v58 }
  0xee   :  { %v440_v8 = vmul.f32 1.442695, %v414_v55  ;;  %v384_v9 = vsub.f32 %v818_v13, %v368_v59  ;;  %596 = vpow2.f32 %v426_v2  ;;  %v359_v11 = vmul.f32 2.0, %v177_v56 }
  0xef   :  { %v392_v10 = vmax.f32 %v376_v4, 0.0  ;;  %v367_v12 = vmul.f32 2.0, %v217_v57  ;;  %598 = vpow2.f32 %v442_v3  ;;  %v362_v16 = vmul.f32 2.0, %v557_v60 }
  0xf0   :  { %v400_v15 = vmax.f32 %v384_v9, 0.0  ;;  %v370_v19 = vmul.f32 2.0, %v569_v1  ;;  %600 = vpow2.f32 %v424_v7  ;;  %v375_v21 = vsub.f32 %v812_v62, %v359_v11 }
  0xf1   :  { %v409_v20 = vmul.f32 -0.5, %v392_v10  ;;  %v383_v61 = vsub.f32 %v820_v14, %v367_v12  ;;  %602 = vpow2.f32 %v440_v8  ;;  %v378_v23 = vsub.f32 %v814_v63, %v362_v16 }
  0xf2   :  { %v417_v22 = vmul.f32 -0.5, %v400_v15  ;;  %v386_v13 = vsub.f32 %v822_v17, %v370_v19  ;;  %v391_v25 = vmax.f32 %v375_v21, 0.0  ;;  %v361_v27 = vmul.f32 2.0, %v187_v5 }
  0xf3   :  { %v430_v24 = vmul.f32 1.442695, %v409_v20  ;;  %v399_v26 = vmax.f32 %v383_v61, 0.0  ;;  %v394_v29 = vmax.f32 %v378_v23, 0.0  ;;  %v369_v31 = vmul.f32 2.0, %v227_v6 }
  0xf4   :  { %v446_v28 = vmul.f32 1.442695, %v417_v22  ;;  %v402_v30 = vmax.f32 %v386_v13, 0.0  ;;  %v589_v32 = vpop.eup %588  ;;  %v408_v33 = vmul.f32 -0.5, %v391_v25  ;;  %v377_v14 = vsub.f32 %v816_v0, %v361_v27 }
  0xf5   :  { %604 = vpow2.f32 %v430_v24  ;;  %v416_v62 = vmul.f32 -0.5, %v399_v26  ;;  %v591_v34 = vpop.eup %590  ;;  %v454_v35 = vmul.f32 %v589_v32, %v808_v54  ;;  %v411_v63 = vmul.f32 -0.5, %v394_v29 }
  0xf6   :  { %606 = vpow2.f32 %v446_v28  ;;  %v419_v17 = vmul.f32 -0.5, %v402_v30  ;;  %v593_v36 = vpop.eup %592  ;;  %v462_v37 = vmul.f32 %v591_v34, %v808_v54  ;;  %v428_v38 = vmul.f32 1.442695, %v408_v33 }
  0xf7   :  { %v444_v39 = vmul.f32 1.442695, %v416_v62  ;;  %v393_v40 = vmax.f32 %v377_v14, 0.0  ;;  %v595_v41 = vpop.eup %594  ;;  %470 = vst [vmem:[#allocation3 + $0x8] sm:$0xff] %v454_v35  ;;  %v453_v42 = vmul.f32 %v593_v36, %v808_v54  ;;  %v434_v43 = vmul.f32 1.442695, %v411_v63 }
  0xf8   :  { %v450_v44 = vmul.f32 1.442695, %v419_v17  ;;  %v385_v0 = vsub.f32 %v824_v18, %v369_v31  ;;  %v597_v45 = vpop.eup %596  ;;  %478 = vst [vmem:[#allocation3 + $0x48] sm:$0xff] %v462_v37  ;;  %v461_v46 = vmul.f32 %v595_v41, %v808_v54  ;;  %608 = vpow2.f32 %v428_v38 }
  0xf9   :  { %v410_v47 = vmul.f32 -0.5, %v393_v40  ;;  %v599_v48 = vpop.eup %598  ;;  %469 = vst [vmem:[#allocation3] sm:$0xff] %v453_v42  ;;  %v456_v49 = vmul.f32 %v597_v45, %v808_v54  ;;  %610 = vpow2.f32 %v444_v39 }
  0xfa   :  { %v401_v50 = vmax.f32 %v385_v0, 0.0  ;;  %v601_v51 = vpop.eup %600  ;;  %477 = vst [vmem:[#allocation3 + $0x40] sm:$0xff] %v461_v46  ;;  %v464_v52 = vmul.f32 %v599_v48, %v808_v54  ;;  %612 = vpow2.f32 %v434_v43 }
  0xfb   :  { %v432_v53 = vmul.f32 1.442695, %v410_v47  ;;  %v603_v56 = vpop.eup %602  ;;  %472 = vst [vmem:[#allocation3 + $0x18] sm:$0xff] %v456_v49  ;;  %v455_v18 = vmul.f32 %v601_v51, %v808_v54  ;;  %614 = vpow2.f32 %v450_v44 }
  0xfc   :  { %v418_v57 = vmul.f32 -0.5, %v401_v50  ;;  %480 = vst [vmem:[#allocation3 + $0x58] sm:$0xff] %v464_v52  ;;  %v463_v58 = vmul.f32 %v603_v56, %v808_v54 }
  0xfd   :  { %616 = vpow2.f32 %v432_v53  ;;  %471 = vst [vmem:[#allocation3 + $0x10] sm:$0xff] %v455_v18 }
  0xfe   :  { %v448_v55 = vmul.f32 1.442695, %v418_v57  ;;  %479 = vst [vmem:[#allocation3 + $0x50] sm:$0xff] %v463_v58 }
  0xff   :  { %v605_v59 = vpop.eup %604 }
 0x100   :  { %v607_v60 = vpop.eup %606  ;;  %v458_v1 = vmul.f32 %v605_v59, %v808_v54  ;;  %618 = vpow2.f32 %v448_v55 }
 0x101   :  { %v466_v2 = vmul.f32 %v607_v60, %v808_v54 }
 0x102   :  { %474 = vst [vmem:[#allocation3 + $0x28] sm:$0xff] %v458_v1  ;;  %v609_v3 = vpop.eup %608 }
 0x103   :  { %482 = vst [vmem:[#allocation3 + $0x68] sm:$0xff] %v466_v2  ;;  %v611_v4 = vpop.eup %610  ;;  %v457_v5 = vmul.f32 %v609_v3, %v808_v54 }
 0x104   :  { %v613_v6 = vpop.eup %612  ;;  %v465_v7 = vmul.f32 %v611_v4, %v808_v54 }
 0x105   :  { %v615_v8 = vpop.eup %614  ;;  %473 = vst [vmem:[#allocation3 + $0x20] sm:$0xff] %v457_v5  ;;  %v460_v9 = vmul.f32 %v613_v6, %v808_v54 }
 0x106   :  { %481 = vst [vmem:[#allocation3 + $0x60] sm:$0xff] %v465_v7  ;;  %v468_v11 = vmul.f32 %v615_v8, %v808_v54 }
 0x107   :  { %v617_v10 = vpop.eup %616  ;;  %476 = vst [vmem:[#allocation3 + $0x38] sm:$0xff] %v460_v9 }
 0x108   :  { %v459_v12 = vmul.f32 %v617_v10, %v808_v54  ;;  %484 = vst [vmem:[#allocation3 + $0x78] sm:$0xff] %v468_v11 }
 0x10a   :  { %v619_v15 = vpop.eup %618  ;;  %475 = vst [vmem:[#allocation3 + $0x30] sm:$0xff] %v459_v12 }
 0x10b   :  { %v467_v16 = vmul.f32 %v619_v15, %v808_v54 }
 0x10d   :  { %483 = vst [vmem:[#allocation3 + $0x70] sm:$0xff] %v467_v16 }
 0x10e   :  { %631 = shalt.err (!%p628_p4)
}
 0x10f   :  { %s632_s17 = scalar_lea.hbm %s867_s5, 2048 }
 0x110   :  { %p633_p5 = scmp.ne.s32.totalorder %s867_s5, %s632_s17  ;;  %p636_p6 = scmp.lt.u32.totalorder %s632_s17, %s867_s5 }
 0x112   :  { %p638_p7 = pnand %p636_p6, %p633_p5 }
 0x114   :  { %641 = shalt.err (!%p638_p7)
}
 0x115   :  { %s646_s22 = smov 128   ;;  %s647_s23 = smov 8  }
 0x116   :  { %496 = dma.vmem_to_hbm [thread:$0]  %s491_s4, 2048, %s867_s5, [#allocation4], %s646_s22, %s646_s22, %s647_s23  }
 0x117   :  { %642 = dma.done.wait [#allocation4], 2048  }
 0x118   :  { %643 = vsyncadd [#allocation4], 4294965248 }
 0x119   :  { %500 = vsyncpa [#allocation4], 1 }

</bundles_post_ra>
